<compile_context>
chip_gen: v5e
topology: v5e:2x2
jax: 0.10.0
libtpu: 0.0.40
codegen_flags: <defaults>
</compile_context>

<pallas_src>
import functools
import math

import jax
import jax.numpy as jnp
from jax.experimental import pallas as pl
from jax.experimental.pallas import tpu as pltpu

_LANE = 128
_TARGET_BLOCK_BYTES = 2 * 1024 * 1024  # ~2 MiB per block; 4 buffers ~ 8 MiB VMEM


def _round_up(a, m):
    return ((a + m - 1) // m) * m


def _drop_path_kernel(scale_ref, x_ref, o_ref):
    """One (tb, tn) tile: broadcast-multiply by the per-sample scale.

    scale_ref: (tb, 1) tile (x.dtype) — 0 for dropped samples, 1/keep_prob (or 1)
               for kept samples.
    x_ref / o_ref: (tb, tn) VMEM tiles.
    """
    o_ref[...] = x_ref[...] * scale_ref[...]


def drop_path_forward(x, key, drop_prob=0.0, training=False, scale_by_keep=True,
                      block_rows=None, block_cols=None, donate_input=False):
    """Pallas TPU DropPath forward. Matches drop_path() in the PyTorch reference."""
    if drop_prob == 0.0 or not training:
        return x                                        # identity path

    keep_prob = 1.0 - drop_prob
    orig_shape = x.shape
    B = int(orig_shape[0])
    N = int(math.prod(orig_shape[1:])) if len(orig_shape) > 1 else 1
    x2 = x.reshape(B, N)                                # free row-major reshape

    # Per-sample Bernoulli keep + scale, computed once in JAX (deterministic,
    # independent of the tiling below).
    keep = jax.random.bernoulli(key, p=keep_prob, shape=(B, 1))
    scale_val = (1.0 / keep_prob) if (scale_by_keep and keep_prob > 0.0) else 1.0
    scale2 = jnp.where(keep, jnp.float32(scale_val), jnp.float32(0.0)).astype(x.dtype)

    itemsize = jnp.dtype(x.dtype).itemsize
    sublane = {4: 8, 2: 16, 1: 32}.get(itemsize, 8)     # dtype-aware sublane packing

    # ---- feature tile: lane-dense, balanced, capped by the byte budget ----
    if block_cols is not None:
        tn = N if block_cols >= N else _round_up(block_cols, _LANE)
    elif N % _LANE == 0:
        tn_cap = max(_LANE, (_TARGET_BLOCK_BYTES // (sublane * itemsize)) // _LANE * _LANE)
        n_fblocks = pl.cdiv(N, min(N, tn_cap))
        tn = _round_up(pl.cdiv(N, n_fblocks), _LANE)    # balanced, no skinny tail
    else:
        tn = N                                          # full (possibly unaligned) row

    # ---- batch tile: fill the byte budget, rounded to the sublane multiple ----
    if block_rows is not None:
        tb = B if block_rows >= B else min(B, _round_up(block_rows, sublane))
    else:
        tb_raw = max(1, _TARGET_BLOCK_BYTES // (tn * itemsize))
        if tb_raw >= B:
            tb = B
        else:
            tb = max(sublane, (tb_raw // sublane) * sublane)
            tb = min(tb, B)

    # ---- v7x megacore: guarantee >= 2 grid blocks when possible ----
    grid_b, grid_n = pl.cdiv(B, tb), pl.cdiv(N, tn)
    if grid_b * grid_n == 1:
        if N % _LANE == 0 and N >= 2 * _LANE:
            tn = _round_up(pl.cdiv(N, 2), _LANE)
        elif B >= 2 * sublane:
            tb = _round_up(pl.cdiv(B, 2), sublane)
        grid_b, grid_n = pl.cdiv(B, tb), pl.cdiv(N, tn)

    grid = (grid_b, grid_n)

    out = pl.pallas_call(
        _drop_path_kernel,
        out_shape=jax.ShapeDtypeStruct((B, N), x.dtype),
        grid_spec=pltpu.PrefetchScalarGridSpec(
            num_scalar_prefetch=0,
            grid=grid,
            in_specs=[
                pl.BlockSpec((tb, 1), lambda bi, ni: (bi, 0)),    # per-sample scale
                pl.BlockSpec((tb, tn), lambda bi, ni: (bi, ni)),  # x tile
            ],
            out_specs=pl.BlockSpec((tb, tn), lambda bi, ni: (bi, ni)),
        ),
        compiler_params=pltpu.CompilerParams(
            dimension_semantics=("parallel", "parallel")),
        cost_estimate=pl.CostEstimate(
            flops=B * N,
            transcendentals=0,
            bytes_accessed=(2 * B * N + B) * itemsize),
        input_output_aliases=({1: 0} if donate_input else {}),
    )(scale2, x2)

    return out.reshape(orig_shape)


def _check_rows(y, x, keep_prob, scale_by_keep):
    """Each sample row must be either entirely dropped (zeros) or entirely kept."""
    B = x.shape[0]
    yf = jnp.reshape(y, (B, -1)).astype(jnp.float32)
    xf = jnp.reshape(x, (B, -1))
    scale_val = (1.0 / keep_prob) if (scale_by_keep and keep_prob > 0.0) else 1.0
    # expected computed in x's dtype, matching the kernel's native-dtype multiply
    exp = (xf * jnp.asarray(scale_val, x.dtype)).astype(jnp.float32)
    tol = 1e-5 if x.dtype == jnp.float32 else 2e-2
    for b in range(B):
        row_zero = bool(jnp.all(yf[b] == 0.0))
        row_kept = bool(jnp.allclose(yf[b], exp[b], atol=tol, rtol=tol))
        assert row_zero or row_kept, f"row {b} is neither dropped nor kept"


if __name__ == "__main__":
    root = jax.random.PRNGKey(0)
    kx, kx2, kd1, kd2 = jax.random.split(root, 4)

    drop_prob = 0.35
    keep_prob = 1.0 - drop_prob

    # --- main case: x [bs=2, ch=4, 16, 16] ---
    x = jax.random.normal(kx, (2, 4, 16, 16), jnp.float32)
    y = jax.block_until_ready(drop_path_forward(x, kd1, drop_prob, training=True))
    assert y.shape == x.shape and y.dtype == x.dtype
    _check_rows(y, x, keep_prob, scale_by_keep=True)

    # Determinism: same key -> identical output.
    y2 = jax.block_until_ready(drop_path_forward(x, kd1, drop_prob, training=True))
    assert bool(jnp.array_equal(y, y2))

    # Tiling-independence: forcing 256-lane feature tiles gives the same result.
    y3 = jax.block_until_ready(
        drop_path_forward(x, kd1, drop_prob, training=True, block_cols=256))
    _check_rows(y3, x, keep_prob, scale_by_keep=True)
    assert bool(jnp.array_equal(y, y3))

    # --- larger batch (batch tiling path), f32 ---
    xb = jax.random.normal(kx2, (16, 4, 16, 16), jnp.float32)
    yb = jax.block_until_ready(drop_path_forward(xb, kd2, 0.5, training=True))
    _check_rows(yb, xb, 0.5, scale_by_keep=True)

    # scale_by_keep=False: kept rows equal x exactly.
    yn = jax.block_until_ready(
        drop_path_forward(xb, kd2, 0.5, training=True, scale_by_keep=False))
    _check_rows(yn, xb, 0.5, scale_by_keep=False)

    # --- bf16 path: native-dtype multiply, 16-sublane-aware tiling ---
    xh = xb.astype(jnp.bfloat16)
    yh = jax.block_until_ready(drop_path_forward(xh, kd2, 0.5, training=True))
    assert yh.dtype == jnp.bfloat16
    _check_rows(yh, xh, 0.5, scale_by_keep=True)

    # --- eval mode / zero drop prob: identity (matches PyTorch early return) ---
    assert drop_path_forward(x, kd1, drop_prob, training=False) is x
    assert drop_path_forward(x, kd1, 0.0, training=True) is x

    print("KERNEL_OK")
</pallas_src>

<mosaic_0001>
module attributes {stable_mosaic.version = 11 : i64} {
  func.func @_drop_path_kernel(%arg0: i32, %arg1: i32, %arg2: memref<2x1xf32, #tpu.memory_space<vmem>>, %arg3: memref<2x512xf32, #tpu.memory_space<vmem>>, %arg4: memref<2x512xf32, #tpu.memory_space<vmem>>) attributes {dimension_semantics = [#tpu.dimension_semantics<parallel>, #tpu.dimension_semantics<parallel>], iteration_bounds = array<i64: 1, 2>, scalar_prefetch = 0 : i64, scratch_operands = 0 : i64, tpu.core_type = #tpu.core_type<tc>, window_params = [{transform_indices = @transform_0, window_bounds = array<i64: 2, 1>}, {transform_indices = @transform_1, window_bounds = array<i64: 2, 512>}, {transform_indices = @transform_2, window_bounds = array<i64: 2, 512>}]} {
    %c0 = arith.constant 0 : index
    %c0_0 = arith.constant 0 : index
    %0 = vector.load %arg3[%c0, %c0_0] : memref<2x512xf32, #tpu.memory_space<vmem>>, vector<2x512xf32>
    %c0_1 = arith.constant 0 : index
    %c0_2 = arith.constant 0 : index
    %1 = vector.load %arg2[%c0_1, %c0_2] : memref<2x1xf32, #tpu.memory_space<vmem>>, vector<2x1xf32>
    %2 = vector.broadcast %1 : vector<2x1xf32> to vector<2x512xf32>
    %3 = arith.mulf %0, %2 : vector<2x512xf32>
    %c0_3 = arith.constant 0 : index
    %c0_4 = arith.constant 0 : index
    %4 = vector.load %arg4[%c0_3, %c0_4] : memref<2x512xf32, #tpu.memory_space<vmem>>, vector<2x512xf32>
    tpu.vector_store %arg4[%c0_3, %c0_4], %3 {strides = array<i32>} : memref<2x512xf32, #tpu.memory_space<vmem>>, vector<2x512xf32>,
    return
  }
  func.func @transform_0(%arg0: i32, %arg1: i32) -> (i32, i32) {
    %c0_i32 = arith.constant 0 : i32
    %c0_i32_0 = arith.constant 0 : i32
    return %arg0, %c0_i32 : i32, i32
  }
  func.func @transform_1(%arg0: i32, %arg1: i32) -> (i32, i32) {
    %c0_i32 = arith.constant 0 : i32
    return %arg0, %arg1 : i32, i32
  }
  func.func @transform_2(%arg0: i32, %arg1: i32) -> (i32, i32) {
    %c0_i32 = arith.constant 0 : i32
    return %arg0, %arg1 : i32, i32
  }
}

</mosaic_0001>

<bundles_post_ra>
// kernel: tpu_custom_call.1
= control target key start
LH: loop header
LB: loop body
LE: loop exit
PB: predicated region body
PF: predicated region fallthrough
CT: control target
= control target key end

     0   :  { %7 = vsyncpa [#allocation3], 0  ;;  %s667_s0 = inlined_call_operand.vmem [shape: f32[2,1], index: 0, kind: input, shape index: {}]   ;;  %s668_s1 = inlined_call_operand.hbm [shape: f32[2,1024], index: 1, kind: input, shape index: {}]   ;;  %s669_s2 = inlined_call_operand.hbm [shape: f32[2,1024], index: 2, kind: output, shape index: {}]  }
   0x1   :  { %9 = vsyncpa [#allocation3 + $0x1], 0 }
   0x2   :  { %10 = vsyncpa [#allocation4], 0 }
   0x3   :  { %12 = vsyncpa [#allocation4 + $0x1], 0  ;;  %s544_s9 = smov 0   ;;  %s546_s10 = smov 0  }
   0x4   :  { %s548_s11 = smov 0   ;;  %s550_s12 = smov 0  }
   0x5   :  { %s552_s13 = smov 0   ;;  %s554_s14 = smov 0  }
   0x6 LB: > { %s330_s15 = sadd.s32 4294967295, %s525_s14   ;;  %s331_s16 = sadd.s32 4294967294, %s525_s14   ;;  %s525_s14 = sphi %s554_s14, %s18_s14   ;;  %s521_s13 = sphi %s552_s13, %s678_s13   ;;  %s517_s12 = sphi %s550_s12, %s677_s12   ;;  %s513_s11 = sphi %s548_s11, %s676_s11   ;;  %s509_s10 = sphi %s546_s10, %s675_s10   ;;  %s505_s9 = sphi %s544_s9, %s674_s9  }
   0x7   : > { %s27_s17 = sadd.s32 1, %s521_s13  ;;  %s65_s18 = sadd.s32 1, %s513_s11 }
   0x8   : > { %p28_p0 = scmp.ge.s32.totalorder %s27_s17, 2  ;;  %p72_p1 = scmp.ne.s32.totalorder %s513_s11, %s509_s10 }
   0x9   : > { %p73_p2 = scmp.eq.s32.totalorder %s525_s14, 0  ;;  %p78_p3 = scmp.ne.s32.totalorder %s509_s10, %s505_s9 }
   0xa   : > { %s680_s17 = smov (%p28_p0, %s27_s17), 0  ;;  %p79_p5 = scmp.eq.s32.totalorder %s330_s15, 0 }
   0xb   : > { %p585_p4 = por %p73_p2, %p72_p1  ;;  %s61_s20 = ssub.s32 %s521_s13, %s680_s17 }
   0xc   : > { %p104_p6 = scmp.eq.s32.totalorder %s330_s15, 1  ;;  %p63_p7 = scmp.eq.s32.totalorder %s61_s20, 0 }
   0xd   : > { %p591_p8 = por %p79_p5, %p78_p3  ;;  %p110_p10 = scmp.eq.s32.totalorder %s331_s16, 1 }
   0xe   : > { %p595_p9 = por %p104_p6, %p72_p1  ;;  %p334_p12 = scmp.ge.s32.totalorder %s525_s14, 2 }
   0xf   : > { %s600_s23 = scalar_select %p63_p7, %s513_s11, %s65_s18  }
  0x10   : > { %p602_p11 = por %p110_p10, %p78_p3  ;;  %p360_p13 = scmp.lt.s32.totalorder %s525_s14, 2 }
  0x11   : > { %s137_s25 = sand.u32 1, %s513_s11   ;;  %s346_s27 = sshll.u32 %s521_s13, 3 }
  0x12   : > { %s335_s26 = sshll.u32 %s137_s25, 3  ;;  %s148_s30 = scalar_lea.hbm %s668_s1, %s346_s27 }
  0x13   : > { %s141_s3 = scalar_lea.vmem [#allocation2], %s335_s26  ;;  %s150_s5 = sshll.u32 %s148_s30, 4  ;;  %s151_s5 = int_to_ptr.hbm [resolvable:$true] %s150_s5 }
  0x14   : > { %s152_s4 = sshll.u32 %s141_s3, 4  ;;  %p353_p0 = pnand %p360_p13, %p585_p4  ;;  %s153_s4 = int_to_ptr.vmem [resolvable:$true] %s152_s4 }
  0x15   : > { %p338_p1 = scmp.ge.s32.totalorder %s525_s14, 1  ;;  %p157_p2 = scmp.lt.s32.totalorder %s525_s14, 3 }
  0x16   : > { %s138_s6 = scalar_lea.sflag [#allocation3], %s137_s25 }
  0x17   : > { %355 = dma.hbm_to_vmem [thread:$0]  (!%p353_p0), %s151_s5, 128, %s153_s4, %s138_s6  }
  0x18   : > { %p158_p3 = pnand %p338_p1, %p157_p2 }
  0x19   : > { %s618_s7 = sand.u32 (!%p158_p3), 1, %s509_s10  }
  0x1a   : > { %161 = sbr.rel (%p158_p3) target bundleno = 156 (0x9c), region = 28  ;;  %s339_s8 = sshll.u32 (!%p158_p3), %s618_s7, 3 }
  0x1b   : > { %s164_s15 = scalar_lea.sflag (!%p158_p3), [#allocation3], %s618_s7  ;;  %s167_s16 = scalar_lea.vmem (!%p158_p3), [#allocation2], %s339_s8 }
  0x1f   : > { %496 = dma.done.wait (%p591_p8), %s164_s15, 128  }
  0x20   : > { %498 = vsyncadd (%p591_p8), %s164_s15, 4294967168  ;;  %v527_v0 = vmov 0   ;;  %v200_v1 = vld [vmem:[%s667_s0] sm:$0x3]  ;;  %v528_v2 = vmov 269488144  }
  0x21   : > { %412 = vset.pattern.permute.xlu0 %v527_v0  ;;  %v206_v3 = vunpack.c.l.s4 %v528_v2  ;;  %s347_s20 = sshll.u32 %s517_s12, 3  ;;  %v199_v6 = vld [vmem:[%s167_s16] sm:$0xff]  ;;  %s192_s21 = scalar_lea.vmem [#allocation5], %s339_s8 }
  0x22   : > { %203 = vperm.xlu0 %412, %v200_v1   ;;  %s226_s27 = scalar_lea.hbm %s669_s2, %s347_s20  ;;  %s228_s28 = sshll.u32 %s192_s21, 4  ;;  %s229_s28 = int_to_ptr.vmem [resolvable:$true] %s228_s28 }
  0x23   : > { %v207_v4 = vunpack.c.0.s8 %v206_v3  ;;  %s230_s29 = sshll.u32 %s226_s27, 4  ;;  %s213_s30 = scalar_lea.sflag [#allocation4], %s618_s7  ;;  %s231_s29 = int_to_ptr.hbm [resolvable:$true] %s230_s29 }
  0x24   : > { %s457_s3 = sshra.s32 %s231_s29, 4  ;;  %s463_s6 = scalar_lea.hbm %s669_s2, 16  ;;  %s458_s3 = int_to_ptr.hbm [resolvable:$true] %s457_s3 }
  0x25   : > { %s459_s12 = scalar_lea.hbm %s458_s3, 8  ;;  %p464_p7 = scmp.lt.s32.totalorder %s458_s3, %s669_s2 }
  0x26   : > { %p460_p4 = scmp.ne.s32.totalorder %s458_s3, %s459_s12  ;;  %p465_p8 = scmp.lt.s32.totalorder %s463_s6, %s459_s12 }
  0x28   : > { %p461_p5 = pnand %p460_p4, %p595_p9  ;;  %p466_p10 = por %p465_p8, %p464_p7 }
  0x2a   : > { %p462_p6 = pneg %p461_p5 }
  0x2c   : > { %p467_p13 = pnand %p466_p10, %p462_p6 }
  0x94   : > { %v204_v5 = vpop.permute.xlu0 %203 }
  0x95   : > { %v208_v7 = vperm.slane %v204_v5, %v207_v4 }
  0x97   : > { %v210_v8 = vmul.f32 %v208_v7, %v199_v6 }
  0x99   : > { %211 = vst [vmem:[%s192_s21] sm:$0xff] %v210_v8 }
  0x9a   : > { %470 = shalt.err (!%p467_p13)
}
  0x9b   : > { %350 = dma.vmem_to_hbm [thread:$0]  (%p595_p9), %s229_s28, 128, %s231_s29, %s213_s30  }
  0x9c PF: > { %s242_s7 = sand.u32 1, %s505_s9   ;;  %p357_p0 = pnand %p334_p12, %p602_p11 }
  0x9d   : > { %s243_s16 = scalar_lea.sflag [#allocation4], %s242_s7 }
  0x9e   : > { %p358_p1 = pneg %p357_p0 }
  0xa0   : > { %500 = dma.done.wait (%p358_p1), %s243_s16, 128  }
  0xa1   : > { %502 = vsyncadd (%p358_p1), %s243_s16, 4294967168  ;;  %s18_s14 = sadd.s32 1, %s525_s14   ;;  %s674_s9 = smov %s509_s10 }
  0xa2   : > { %p15_p2 = scmp.ge.s32.totalorder %s18_s14, 4   ;;  %s675_s10 = smov %s513_s11 }
  0xa3   : > { %s676_s11 = smov %s600_s23  ;;  %s677_s12 = smov %s521_s13 }
  0xa4   : > { %s678_s13 = smov %s680_s17  ;;  %17 = sbr.rel (!%p15_p2) target bundleno = 6 (0x6), region = 76 }
  0xa9   :  { %249 = vsyncpa [#allocation3], 1 }
  0xaa   :  { %251 = vsyncpa [#allocation3 + $0x1], 1 }
  0xab   :  { %252 = vsyncpa [#allocation4], 1 }
  0xac   :  { %254 = vsyncpa [#allocation4 + $0x1], 1 }

</bundles_post_ra>
